<compile_context>
chip_gen: v5e
topology: v5e:2x2
jax: 0.10.0
libtpu: 0.0.40
codegen_flags: <defaults>
</compile_context>

<pallas_src>
import jax
import jax.numpy as jnp
from jax.experimental import pallas as pl
from jax.experimental.pallas import tpu as pltpu

BN_EPS = 1e-5

# Layer sizes of TitanicNet.
DIMS = (6, 32, 128, 32, 16, 2)

# Output feature dim padded to a full lane width for a lane-dense store.
OUT_PAD = 128


# ---------------------------------------------------------------------------
# Kernel
# ---------------------------------------------------------------------------
def titanic_kernel(
    x_ref,
    w1_ref, b1_ref,
    w2_ref, b2_ref,
    w3_ref, b3_ref,
    w4_ref, b4_ref,
    wd_ref, bd_ref,
    o_ref,
):
    """One batch tile: 4x (matmul + bias + sigmoid), then 2-class softmax
    expressed as a sigmoid of the logit difference, written lane-dense."""
    h = x_ref[...]

    h = jax.nn.sigmoid(
        jnp.dot(h, w1_ref[...], preferred_element_type=jnp.float32) + b1_ref[...])
    h = jax.nn.sigmoid(
        jnp.dot(h, w2_ref[...], preferred_element_type=jnp.float32) + b2_ref[...])
    h = jax.nn.sigmoid(
        jnp.dot(h, w3_ref[...], preferred_element_type=jnp.float32) + b3_ref[...])
    h = jax.nn.sigmoid(
        jnp.dot(h, w4_ref[...], preferred_element_type=jnp.float32) + b4_ref[...])

    # d = logits[:, 1] - logits[:, 0] computed directly via the pre-folded
    # difference weight (16, 1) / bias (1, 1).
    d = jnp.dot(h, wd_ref[...], preferred_element_type=jnp.float32) + bd_ref[...]
    p1 = jax.nn.sigmoid(d)        # softmax([l0, l1])[1]
    p0 = 1.0 - p1                 # softmax([l0, l1])[0]

    # Lane-dense (TB, 128) store: class 0 in lane 0, class 1 in lane 1, 0 else.
    lane = jax.lax.broadcasted_iota(jnp.int32, o_ref.shape, 1)
    o_ref[...] = jnp.where(lane == 0, p0, jnp.where(lane == 1, p1, 0.0))


# ---------------------------------------------------------------------------
# Wrapper
# ---------------------------------------------------------------------------
def titanic_forward(x, folded_params, *, tb=1024):
    """x: (B, 6) float32. folded_params: (w1,b1,...,w4,b4,wd,bd) as produced
    by fold_params(). Returns (B, 2) softmax probabilities."""
    B, F = x.shape
    assert F == DIMS[0]

    # Batch tile: multiple of 8 sublanes, no bigger than (padded) B.
    tb = max(8, min(tb, ((B + 7) // 8) * 8))
    tb = ((tb + 7) // 8) * 8
    Bp = ((B + tb - 1) // tb) * tb
    if Bp != B:
        x = jnp.pad(x, ((0, Bp - B), (0, 0)))
    grid = (Bp // tb,)

    def x_spec():
        return pl.BlockSpec((tb, DIMS[0]), lambda i: (i, 0))

    def param_spec(p):
        # Explicit binding of `p` (avoids late-binding closure bug); all
        # params are 2-D and fully resident across grid steps.
        assert p.ndim == 2
        return pl.BlockSpec(p.shape, lambda i: (0, 0))

    out_spec = pl.BlockSpec((tb, OUT_PAD), lambda i: (i, 0))

    # Advisory cost estimate for the XLA scheduler.
    flops = 2 * Bp * (sum(DIMS[i] * DIMS[i + 1] for i in range(4)) + DIMS[4])
    transcendentals = Bp * (sum(DIMS[1:5]) + 1)
    bytes_accessed = (
        Bp * DIMS[0] * 4
        + Bp * OUT_PAD * 4
        + sum(int(p.size) * 4 for p in folded_params)
    )

    out = pl.pallas_call(
        titanic_kernel,
        out_shape=jax.ShapeDtypeStruct((Bp, OUT_PAD), jnp.float32),
        grid=grid,
        in_specs=[x_spec()] + [param_spec(p) for p in folded_params],
        out_specs=out_spec,
        compiler_params=pltpu.CompilerParams(
            dimension_semantics=("parallel",)),
        cost_estimate=pl.CostEstimate(
            flops=flops,
            transcendentals=transcendentals,
            bytes_accessed=bytes_accessed),
    )(x, *folded_params)

    return out[:B, : DIMS[-1]]


# ---------------------------------------------------------------------------
# Parameters: raw (PyTorch-style) init, BN folding, pure-JAX reference
# ---------------------------------------------------------------------------
def init_params(key):
    """Raw parameters matching TitanicNet (eval mode). Linear weights are
    stored as (in_features, out_features); biases / BN stats as (1, fout)."""
    params = []
    keys = jax.random.split(key, 16)
    ki = 0
    for li in range(4):
        fin, fout = DIMS[li], DIMS[li + 1]
        w = jax.random.normal(keys[ki], (fin, fout), jnp.float32) * 0.1
        ki += 1
        b = jax.random.normal(keys[ki], (1, fout), jnp.float32) * 0.1
        ki += 1
        gamma = jnp.ones((1, fout), jnp.float32)
        beta = jnp.zeros((1, fout), jnp.float32)
        mean = jax.random.normal(keys[ki], (1, fout), jnp.float32) * 0.05
        ki += 1
        var = jax.random.uniform(keys[ki], (1, fout), jnp.float32, 0.5, 1.5)
        ki += 1
        params += [w, b, gamma, beta, mean, var]
    fin, fout = DIMS[4], DIMS[5]
    w5 = jax.random.normal(keys[ki], (fin, fout), jnp.float32) * 0.1
    ki += 1
    b5 = jax.random.normal(keys[ki], (1, fout), jnp.float32) * 0.1
    params += [w5, b5]
    return tuple(params)


def fold_params(params):
    """Fold eval-mode BatchNorm into the Linear layers, and the final 2-class
    Linear into a single logit-difference column (exact algebra)."""
    p = list(params)
    folded = []
    for li in range(4):
        w, b, g, be, m, v = p[li * 6 : (li + 1) * 6]
        s = g * jax.lax.rsqrt(v + BN_EPS)           # (1, fout)
        wf = (w * s).astype(jnp.float32)            # scale columns of W
        bf = ((b - m) * s + be).astype(jnp.float32)
        folded += [wf, bf]
    w5, b5 = p[24], p[25]
    wd = (w5[:, 1:2] - w5[:, 0:1]).astype(jnp.float32)   # (16, 1)
    bd = (b5[:, 1:2] - b5[:, 0:1]).astype(jnp.float32)   # (1, 1)
    folded += [wd, bd]
    return tuple(folded)


def reference_forward(x, params):
    """Pure-JAX reference with the *unfolded* params (checks the fold too)."""
    p = list(params)
    h = x
    for li in range(4):
        w, b, g, be, m, v = p[li * 6 : (li + 1) * 6]
        h = jax.nn.sigmoid(((h @ w + b) - m) * jax.lax.rsqrt(v + BN_EPS) * g + be)
    w5, b5 = p[24], p[25]
    return jax.nn.softmax(h @ w5 + b5, axis=-1)


# ---------------------------------------------------------------------------
if __name__ == "__main__":
    key = jax.random.PRNGKey(0)
    k_x, k_p = jax.random.split(key)

    B = 16
    x = jax.random.normal(k_x, (B, DIMS[0]), jnp.float32)
    params = init_params(k_p)
    folded = fold_params(params)

    # tb=8 -> grid=(2,) so the batch-tiled pipeline path is exercised even at
    # this small demo size (production default tb=1024).
    out = titanic_forward(x, folded, tb=8)
    out = jax.block_until_ready(out)

    ref = reference_forward(x, params)
    assert out.shape == (B, 2)
    assert jnp.allclose(out, ref, atol=1e-5, rtol=1e-5), "mismatch vs reference"
    assert jnp.allclose(jnp.sum(out, axis=-1), jnp.ones((B,)), atol=1e-5)

    print("KERNEL_OK")
</pallas_src>

<mosaic_0001>
module attributes {stable_mosaic.version = 11 : i64} {
  func.func @titanic_kernel(%arg0: i32, %arg1: memref<8x6xf32, #tpu.memory_space<vmem>>, %arg2: memref<6x32xf32, #tpu.memory_space<vmem>>, %arg3: memref<1x32xf32, #tpu.memory_space<vmem>>, %arg4: memref<32x128xf32, #tpu.memory_space<vmem>>, %arg5: memref<1x128xf32, #tpu.memory_space<vmem>>, %arg6: memref<128x32xf32, #tpu.memory_space<vmem>>, %arg7: memref<1x32xf32, #tpu.memory_space<vmem>>, %arg8: memref<32x16xf32, #tpu.memory_space<vmem>>, %arg9: memref<1x16xf32, #tpu.memory_space<vmem>>, %arg10: memref<16x1xf32, #tpu.memory_space<vmem>>, %arg11: memref<1x1xf32, #tpu.memory_space<vmem>>, %arg12: memref<8x128xf32, #tpu.memory_space<vmem>>) attributes {dimension_semantics = [#tpu.dimension_semantics<parallel>], iteration_bounds = array<i64: 2>, scalar_prefetch = 0 : i64, scratch_operands = 0 : i64, tpu.core_type = #tpu.core_type<tc>, window_params = [{transform_indices = @transform_0, window_bounds = array<i64: 8, 6>}, {pipeline_mode = #tpu.pipeline_mode<synchronous>, transform_indices = @transform_1, window_bounds = array<i64: 6, 32>}, {pipeline_mode = #tpu.pipeline_mode<synchronous>, transform_indices = @transform_2, window_bounds = array<i64: 1, 32>}, {pipeline_mode = #tpu.pipeline_mode<synchronous>, transform_indices = @transform_3, window_bounds = array<i64: 32, 128>}, {pipeline_mode = #tpu.pipeline_mode<synchronous>, transform_indices = @transform_4, window_bounds = array<i64: 1, 128>}, {pipeline_mode = #tpu.pipeline_mode<synchronous>, transform_indices = @transform_5, window_bounds = array<i64: 128, 32>}, {pipeline_mode = #tpu.pipeline_mode<synchronous>, transform_indices = @transform_6, window_bounds = array<i64: 1, 32>}, {pipeline_mode = #tpu.pipeline_mode<synchronous>, transform_indices = @transform_7, window_bounds = array<i64: 32, 16>}, {pipeline_mode = #tpu.pipeline_mode<synchronous>, transform_indices = @transform_8, window_bounds = array<i64: 1, 16>}, {pipeline_mode = #tpu.pipeline_mode<synchronous>, transform_indices = @transform_9, window_bounds = array<i64: 16, 1>}, {pipeline_mode = #tpu.pipeline_mode<synchronous>, transform_indices = @transform_10, window_bounds = array<i64: 1, 1>}, {transform_indices = @transform_11, window_bounds = array<i64: 8, 128>}]} {
    %c0 = arith.constant 0 : index
    %c0_0 = arith.constant 0 : index
    %0 = vector.load %arg1[%c0, %c0_0] : memref<8x6xf32, #tpu.memory_space<vmem>>, vector<8x6xf32>
    %c0_1 = arith.constant 0 : index
    %c0_2 = arith.constant 0 : index
    %1 = vector.load %arg2[%c0_1, %c0_2] : memref<6x32xf32, #tpu.memory_space<vmem>>, vector<6x32xf32>
    %cst = arith.constant dense<0.000000e+00> : vector<8x32xf32>
    %2 = tpu.matmul %0, %1, %cst {dimension_numbers = #tpu.dot_dimension_numbers<[1], [0], [0], [1], [0, 0, 1, 1], [], []>} : vector<8x6xf32>, vector<6x32xf32>, vector<8x32xf32> -> vector<8x32xf32>
    %c0_3 = arith.constant 0 : index
    %c0_4 = arith.constant 0 : index
    %3 = vector.load %arg3[%c0_3, %c0_4] : memref<1x32xf32, #tpu.memory_space<vmem>>, vector<1x32xf32>
    %4 = vector.broadcast %3 : vector<1x32xf32> to vector<8x32xf32>
    %5 = arith.addf %2, %4 : vector<8x32xf32>
    %6 = arith.negf %5 : vector<8x32xf32>
    %7 = math.exp %6 : vector<8x32xf32>
    %cst_5 = arith.constant 1.000000e+00 : f32
    %8 = vector.broadcast %cst_5 : f32 to vector<8x32xf32>
    %9 = arith.addf %8, %7 : vector<8x32xf32>
    %10 = arith.divf %8, %9 : vector<8x32xf32>
    %c0_6 = arith.constant 0 : index
    %c0_7 = arith.constant 0 : index
    %11 = vector.load %arg4[%c0_6, %c0_7] : memref<32x128xf32, #tpu.memory_space<vmem>>, vector<32x128xf32>
    %cst_8 = arith.constant dense<0.000000e+00> : vector<8x128xf32>
    %12 = tpu.matmul %10, %11, %cst_8 {dimension_numbers = #tpu.dot_dimension_numbers<[1], [0], [0], [1], [0, 0, 1, 1], [], []>} : vector<8x32xf32>, vector<32x128xf32>, vector<8x128xf32> -> vector<8x128xf32>
    %c0_9 = arith.constant 0 : index
    %c0_10 = arith.constant 0 : index
    %13 = vector.load %arg5[%c0_9, %c0_10] : memref<1x128xf32, #tpu.memory_space<vmem>>, vector<1x128xf32>
    %14 = vector.broadcast %13 : vector<1x128xf32> to vector<8x128xf32>
    %15 = arith.addf %12, %14 : vector<8x128xf32>
    %16 = arith.negf %15 : vector<8x128xf32>
    %17 = math.exp %16 : vector<8x128xf32>
    %cst_11 = arith.constant 1.000000e+00 : f32
    %18 = vector.broadcast %cst_11 : f32 to vector<8x128xf32>
    %19 = arith.addf %18, %17 : vector<8x128xf32>
    %20 = arith.divf %18, %19 : vector<8x128xf32>
    %c0_12 = arith.constant 0 : index
    %c0_13 = arith.constant 0 : index
    %21 = vector.load %arg6[%c0_12, %c0_13] : memref<128x32xf32, #tpu.memory_space<vmem>>, vector<128x32xf32>
    %cst_14 = arith.constant dense<0.000000e+00> : vector<8x32xf32>
    %22 = tpu.matmul %20, %21, %cst_14 {dimension_numbers = #tpu.dot_dimension_numbers<[1], [0], [0], [1], [0, 0, 1, 1], [], []>} : vector<8x128xf32>, vector<128x32xf32>, vector<8x32xf32> -> vector<8x32xf32>
    %c0_15 = arith.constant 0 : index
    %c0_16 = arith.constant 0 : index
    %23 = vector.load %arg7[%c0_15, %c0_16] : memref<1x32xf32, #tpu.memory_space<vmem>>, vector<1x32xf32>
    %24 = vector.broadcast %23 : vector<1x32xf32> to vector<8x32xf32>
    %25 = arith.addf %22, %24 : vector<8x32xf32>
    %26 = arith.negf %25 : vector<8x32xf32>
    %27 = math.exp %26 : vector<8x32xf32>
    %cst_17 = arith.constant 1.000000e+00 : f32
    %28 = vector.broadcast %cst_17 : f32 to vector<8x32xf32>
    %29 = arith.addf %28, %27 : vector<8x32xf32>
    %30 = arith.divf %28, %29 : vector<8x32xf32>
    %c0_18 = arith.constant 0 : index
    %c0_19 = arith.constant 0 : index
    %31 = vector.load %arg8[%c0_18, %c0_19] : memref<32x16xf32, #tpu.memory_space<vmem>>, vector<32x16xf32>
    %cst_20 = arith.constant dense<0.000000e+00> : vector<8x16xf32>
    %32 = tpu.matmul %30, %31, %cst_20 {dimension_numbers = #tpu.dot_dimension_numbers<[1], [0], [0], [1], [0, 0, 1, 1], [], []>} : vector<8x32xf32>, vector<32x16xf32>, vector<8x16xf32> -> vector<8x16xf32>
    %c0_21 = arith.constant 0 : index
    %c0_22 = arith.constant 0 : index
    %33 = vector.load %arg9[%c0_21, %c0_22] : memref<1x16xf32, #tpu.memory_space<vmem>>, vector<1x16xf32>
    %34 = vector.broadcast %33 : vector<1x16xf32> to vector<8x16xf32>
    %35 = arith.addf %32, %34 : vector<8x16xf32>
    %36 = arith.negf %35 : vector<8x16xf32>
    %37 = math.exp %36 : vector<8x16xf32>
    %cst_23 = arith.constant 1.000000e+00 : f32
    %38 = vector.broadcast %cst_23 : f32 to vector<8x16xf32>
    %39 = arith.addf %38, %37 : vector<8x16xf32>
    %40 = arith.divf %38, %39 : vector<8x16xf32>
    %c0_24 = arith.constant 0 : index
    %c0_25 = arith.constant 0 : index
    %41 = vector.load %arg10[%c0_24, %c0_25] : memref<16x1xf32, #tpu.memory_space<vmem>>, vector<16x1xf32>
    %cst_26 = arith.constant dense<0.000000e+00> : vector<8x1xf32>
    %42 = tpu.matmul %40, %41, %cst_26 {dimension_numbers = #tpu.dot_dimension_numbers<[1], [0], [0], [1], [0, 0, 1, 1], [], []>} : vector<8x16xf32>, vector<16x1xf32>, vector<8x1xf32> -> vector<8x1xf32>
    %c0_27 = arith.constant 0 : index
    %c0_28 = arith.constant 0 : index
    %43 = vector.load %arg11[%c0_27, %c0_28] : memref<1x1xf32, #tpu.memory_space<vmem>>, vector<1x1xf32>
    %44 = vector.broadcast %43 : vector<1x1xf32> to vector<8x1xf32>
    %45 = arith.addf %42, %44 : vector<8x1xf32>
    %46 = arith.negf %45 : vector<8x1xf32>
    %47 = math.exp %46 : vector<8x1xf32>
    %cst_29 = arith.constant 1.000000e+00 : f32
    %48 = vector.broadcast %cst_29 : f32 to vector<8x1xf32>
    %49 = arith.addf %48, %47 : vector<8x1xf32>
    %50 = arith.divf %48, %49 : vector<8x1xf32>
    %cst_30 = arith.constant 1.000000e+00 : f32
    %51 = vector.broadcast %cst_30 : f32 to vector<8x1xf32>
    %52 = arith.subf %51, %50 : vector<8x1xf32>
    %53 = tpu.iota {dimensions = array<i32: 1>} : vector<8x128xi32>
    %c0_i32 = arith.constant 0 : i32
    %54 = vector.broadcast %c0_i32 : i32 to vector<8x128xi32>
    %55 = arith.cmpi eq, %53, %54 : vector<8x128xi32>
    %c1_i32 = arith.constant 1 : i32
    %56 = vector.broadcast %c1_i32 : i32 to vector<8x128xi32>
    %57 = arith.cmpi eq, %53, %56 : vector<8x128xi32>
    %cst_31 = arith.constant 0.000000e+00 : f32
    %58 = vector.shape_cast %50 : vector<8x1xf32> to vector<8x1xf32>
    %59 = vector.broadcast %58 : vector<8x1xf32> to vector<8x128xf32>
    %60 = vector.broadcast %cst_31 : f32 to vector<8x128xf32>
    %61 = arith.select %57, %59, %60 : vector<8x128xi1>, vector<8x128xf32>
    %62 = vector.shape_cast %52 : vector<8x1xf32> to vector<8x1xf32>
    %63 = vector.broadcast %62 : vector<8x1xf32> to vector<8x128xf32>
    %64 = arith.select %55, %63, %61 : vector<8x128xi1>, vector<8x128xf32>
    %c0_32 = arith.constant 0 : index
    %c0_33 = arith.constant 0 : index
    %65 = vector.load %arg12[%c0_32, %c0_33] : memref<8x128xf32, #tpu.memory_space<vmem>>, vector<8x128xf32>
    tpu.vector_store %arg12[%c0_32, %c0_33], %64 {strides = array<i32>} : memref<8x128xf32, #tpu.memory_space<vmem>>, vector<8x128xf32>,
    return
  }
  func.func @transform_0(%arg0: i32) -> (i32, i32) {
    %c0_i32 = arith.constant 0 : i32
    %c0_i32_0 = arith.constant 0 : i32
    return %arg0, %c0_i32 : i32, i32
  }
  func.func @transform_1(%arg0: i32) -> (i32, i32) {
    %c0_i32 = arith.constant 0 : i32
    %c0_i32_0 = arith.constant 0 : i32
    %c0_i32_1 = arith.constant 0 : i32
    return %c0_i32, %c0_i32_0 : i32, i32
  }
  func.func @transform_2(%arg0: i32) -> (i32, i32) {
    %c0_i32 = arith.constant 0 : i32
    %c0_i32_0 = arith.constant 0 : i32
    %c0_i32_1 = arith.constant 0 : i32
    return %c0_i32, %c0_i32_0 : i32, i32
  }
  func.func @transform_3(%arg0: i32) -> (i32, i32) {
    %c0_i32 = arith.constant 0 : i32
    %c0_i32_0 = arith.constant 0 : i32
    %c0_i32_1 = arith.constant 0 : i32
    return %c0_i32, %c0_i32_0 : i32, i32
  }
  func.func @transform_4(%arg0: i32) -> (i32, i32) {
    %c0_i32 = arith.constant 0 : i32
    %c0_i32_0 = arith.constant 0 : i32
    %c0_i32_1 = arith.constant 0 : i32
    return %c0_i32, %c0_i32_0 : i32, i32
  }
  func.func @transform_5(%arg0: i32) -> (i32, i32) {
    %c0_i32 = arith.constant 0 : i32
    %c0_i32_0 = arith.constant 0 : i32
    %c0_i32_1 = arith.constant 0 : i32
    return %c0_i32, %c0_i32_0 : i32, i32
  }
  func.func @transform_6(%arg0: i32) -> (i32, i32) {
    %c0_i32 = arith.constant 0 : i32
    %c0_i32_0 = arith.constant 0 : i32
    %c0_i32_1 = arith.constant 0 : i32
    return %c0_i32, %c0_i32_0 : i32, i32
  }
  func.func @transform_7(%arg0: i32) -> (i32, i32) {
    %c0_i32 = arith.constant 0 : i32
    %c0_i32_0 = arith.constant 0 : i32
    %c0_i32_1 = arith.constant 0 : i32
    return %c0_i32, %c0_i32_0 : i32, i32
  }
  func.func @transform_8(%arg0: i32) -> (i32, i32) {
    %c0_i32 = arith.constant 0 : i32
    %c0_i32_0 = arith.constant 0 : i32
    %c0_i32_1 = arith.constant 0 : i32
    return %c0_i32, %c0_i32_0 : i32, i32
  }
  func.func @transform_9(%arg0: i32) -> (i32, i32) {
    %c0_i32 = arith.constant 0 : i32
    %c0_i32_0 = arith.constant 0 : i32
    %c0_i32_1 = arith.constant 0 : i32
    return %c0_i32, %c0_i32_0 : i32, i32
  }
  func.func @transform_10(%arg0: i32) -> (i32, i32) {
    %c0_i32 = arith.constant 0 : i32
    %c0_i32_0 = arith.constant 0 : i32
    %c0_i32_1 = arith.constant 0 : i32
    return %c0_i32, %c0_i32_0 : i32, i32
  }
  func.func @transform_11(%arg0: i32) -> (i32, i32) {
    %c0_i32 = arith.constant 0 : i32
    %c0_i32_0 = arith.constant 0 : i32
    return %arg0, %c0_i32 : i32, i32
  }
}

</mosaic_0001>

<bundles_post_ra>
// kernel: tpu_custom_call.1
= control target key start
LH: loop header
LB: loop body
LE: loop exit
PB: predicated region body
PF: predicated region fallthrough
CT: control target
= control target key end

     0   :  { %s1133_s0 = inlined_call_operand.vmem [shape: f32[16,6], index: 0, kind: input, shape index: {}]   ;;  %s1134_s1 = inlined_call_operand.vmem [shape: f32[6,32], index: 1, kind: input, shape index: {}]   ;;  %s1135_s2 = inlined_call_operand.vmem [shape: f32[1,32], index: 2, kind: input, shape index: {}]   ;;  %s1136_s3 = inlined_call_operand.vmem [shape: f32[32,128], index: 3, kind: input, shape index: {}]   ;;  %s1137_s4 = inlined_call_operand.vmem [shape: f32[1,128], index: 4, kind: input, shape index: {}]   ;;  %s1138_s5 = inlined_call_operand.vmem [shape: f32[128,32], index: 5, kind: input, shape index: {}]   ;;  %s1139_s6 = inlined_call_operand.vmem [shape: f32[1,32], index: 6, kind: input, shape index: {}]   ;;  %s1140_s7 = inlined_call_operand.vmem [shape: f32[32,16], index: 7, kind: input, shape index: {}]   ;;  %s1141_s8 = inlined_call_operand.vmem [shape: f32[1,16], index: 8, kind: input, shape index: {}]   ;;  %s1142_s9 = inlined_call_operand.vmem [shape: f32[16,1], index: 9, kind: input, shape index: {}]   ;;  %s1143_s10 = inlined_call_operand.<no memory space> [shape: f32[1,1], index: 10, kind: input, shape index: {}]   ;;  %s1144_s11 = inlined_call_operand.hbm [shape: f32[16,128], index: 11, kind: output, shape index: {}]  }
   0x1   :  { %1145 = sst [smem:[#allocation6_spill]] %s1134_s1  ;;  %v16_v0 = vstv %s1143_s10 }
   0x2   :  { %17 = vst [vmem:[#allocation2] sm:$0x1] %v16_v0 }
   0x3   :  { %18 = vsyncpa [#allocation4], 0 }
   0x4   :  { %20 = vsyncpa [#allocation4 + $0x1], 0  ;;  %s953_s19 = smov 0   ;;  %s955_s20 = smov 0  }
   0x5   :  { %s957_s21 = smov 0   ;;  %s959_s22 = smov 0  }
   0x6 LB: > { %s974_s10 = sadd.s32 4294967295, %s887_s22   ;;  %s739_s23 = sadd.s32 4294967294, %s887_s22   ;;  %s887_s22 = sphi %s959_s22, %s1152_s22   ;;  %s883_s21 = sphi %s957_s21, %s1151_s21   ;;  %s879_s20 = sphi %s955_s20, %s1150_s20   ;;  %s875_s19 = sphi %s953_s19, %s1149_s19  }
   0x7   : > { %s978_s24 = sadd.s32 1, %s887_s22   ;;  %s269_s25 = sadd.s32 1, %s883_s21 }
   0x8   : > { %s266_s26 = ssub.s32 %s887_s22, %s978_s24  ;;  %p279_p0 = scmp.ne.s32.totalorder %s883_s21, %s879_s20 }
   0x9   : > { %p267_p1 = scmp.eq.s32.totalorder %s266_s26, 0  ;;  %p280_p2 = scmp.eq.s32.totalorder %s974_s10, 1 }
   0xa   : > { %p285_p3 = scmp.ne.s32.totalorder %s879_s20, %s875_s19  ;;  %p286_p4 = scmp.eq.s32.totalorder %s739_s23, 1 }
   0xb   : > { %s989_s27 = scalar_select %p267_p1, %s883_s21, %s269_s25  }
   0xc   : > { %p991_p5 = por %p280_p2, %p279_p0  ;;  %p995_p6 = por %p286_p4, %p285_p3 }
   0xd   : > { %p742_p7 = scmp.ge.s32.totalorder %s887_s22, 1  ;;  %p341_p8 = scmp.lt.s32.totalorder %s887_s22, 3 }
   0xf   : > { %p342_p9 = pnand %p742_p7, %p341_p8 }
  0x10   : > { %s1148_s1 = sld [smem:[#allocation6_spill]] (!%p342_p9)  ;;  %p380_p10 = scmp.lt.s32.totalorder (!%p342_p9), %s974_s10, 1 }
  0x11   : > { %345 = sbr.rel (%p342_p9) target bundleno = 946 (0x3b2), region = 64  ;;  %s756_s23 = sshll.u32 (!%p342_p9), %s974_s10, 3 }
  0x12   : > { %s675_s30 = scalar_lea.hbm (!%p342_p9), %s1144_s11, %s756_s23 }
  0x16   : > { %v385_v1 = vld [vmem:[%s1148_s1] sm:$0x3f]  ;;  %vm394_vm0 = vcmask 1045504   ;;  %s381_s13 = scalar_select %p380_p10, %s974_s10, 1  ;;  %vm390_vm1 = vcmask 48128   ;;  %v440_v3 = vld [vmem:[%s1136_s3 + $0x18] sm:$0xff] }
  0x17   : > { %745 = vmatpush.msk.msra.mxu0 %vm394_vm0, %v385_v1  ;;  %v439_v4 = vld [vmem:[%s1136_s3 + $0x10] sm:$0xff]  ;;  %461 = vmatpush.msra.mxu1 %v440_v3  ;;  %v438_v5 = vld [vmem:[%s1136_s3 + $0x8] sm:$0xff]  ;;  %v437_v6 = vld [vmem:[%s1136_s3] sm:$0xff]  ;;  %vm445_vm5 = vcmask 261120  }
  0x18   : > { %s744_s14 = sshll.u32 %s381_s13, 3  ;;  %v800_v7 = vld [vmem:[%s1135_s2] ss:$0 sm:$0xff]  ;;  %v503_v23 = vld [vmem:[%s1138_s5 + $0x78] sm:$0xff]  ;;  %v502_v24 = vld [vmem:[%s1138_s5 + $0x70] sm:$0xff] }
  0x19   : > { %s383_s17 = scalar_lea.vmem %s1133_s0, %s744_s14  ;;  %462 = vmatpush.msra.mxu1 %v439_v4  ;;  %508 = vmatpush.msra.mxu2 %v503_v23  ;;  %v501_v25 = vld [vmem:[%s1138_s5 + $0x68] sm:$0xff]  ;;  %v500_v26 = vld [vmem:[%s1138_s5 + $0x60] sm:$0xff]  ;;  %v499_v27 = vld [vmem:[%s1138_s5 + $0x58] sm:$0xff]  ;;  %s679_s14 = sshll.u32 %s675_s30, 4  ;;  %s680_s14 = int_to_ptr.hbm [resolvable:$true] %s679_s14 }
  0x1a   : > { %v384_v2 = vld [vmem:[%s383_s17] sm:$0xff]  ;;  %v498_v28 = vld [vmem:[%s1138_s5 + $0x50] sm:$0xff]  ;;  %v497_v29 = vld [vmem:[%s1138_s5 + $0x48] sm:$0xff]  ;;  %s377_s17 = sand.u32 1, %s879_s20   ;;  %s839_s10 = sshra.s32 %s680_s14, 4  ;;  %s840_s10 = int_to_ptr.hbm [resolvable:$true] %s839_s10 }
  0x1b   : > { %746 = vmatmul.msk.f32.vlgmr.msra.gmra.mxu0 %vm390_vm1, %v384_v2  ;;  %463 = vmatpush.msra.mxu1 %v438_v5  ;;  %v496_v30 = vld [vmem:[%s1138_s5 + $0x40] sm:$0xff]  ;;  %v495_v31 = vld [vmem:[%s1138_s5 + $0x38] sm:$0xff]  ;;  %v494_v32 = vld [vmem:[%s1138_s5 + $0x30] sm:$0xff]  ;;  %s743_s18 = sshll.u32 %s377_s17, 3  ;;  %s665_s15 = scalar_lea.sflag [#allocation4], %s377_s17 }
  0x1c   : > { %509 = vmatpush.msra.mxu2 %v502_v24  ;;  %v493_v33 = vld [vmem:[%s1138_s5 + $0x28] sm:$0xff]  ;;  %v492_v34 = vld [vmem:[%s1138_s5 + $0x20] sm:$0xff]  ;;  %v491_v35 = vld [vmem:[%s1138_s5 + $0x18] sm:$0xff]  ;;  %s379_s12 = scalar_lea.vmem [#allocation3], %s743_s18  ;;  %s841_s1 = scalar_lea.hbm %s840_s10, 8 }
  0x1d   : > { %464 = vmatpush.msra.mxu1 %v437_v6  ;;  %v490_v36 = vld [vmem:[%s1138_s5 + $0x10] sm:$0xff]  ;;  %v489_v37 = vld [vmem:[%s1138_s5 + $0x8] sm:$0xff]  ;;  %v488_v38 = vld [vmem:[%s1138_s5] sm:$0xff]  ;;  %s677_s13 = sshll.u32 %s379_s12, 4  ;;  %p842_p11 = scmp.ne.s32.totalorder %s840_s10, %s841_s1  ;;  %s678_s13 = int_to_ptr.vmem [resolvable:$true] %s677_s13 }
  0x1e   : > { %510 = vmatpush.msra.mxu2 %v501_v25  ;;  %v801_v39 = vld [vmem:[%s1137_s4] ss:$0 sm:$0xff]  ;;  %v550_v55 = vld [vmem:[%s1140_s7 + $0x18] sm:$0xff]  ;;  %v549_v56 = vld [vmem:[%s1140_s7 + $0x10] sm:$0xff]  ;;  %s845_s18 = scalar_lea.hbm %s1144_s11, 16  ;;  %p846_p0 = scmp.lt.s32.totalorder %s840_s10, %s1144_s11 }
  0x1f   : > { %570 = vmatpush.msra.mxu3 %v550_v55  ;;  %v548_v57 = vld [vmem:[%s1140_s7 + $0x8] sm:$0xff]  ;;  %v547_v58 = vld [vmem:[%s1140_s7] sm:$0xff]  ;;  %p843_p12 = pnand %p842_p11, %p991_p5  ;;  %p847_p1 = scmp.lt.s32.totalorder %s845_s18, %s841_s1 }
  0x20   : > { %511 = vmatpush.msra.mxu2 %v500_v26  ;;  %v802_v59 = vld [vmem:[%s1139_s6] ss:$0 sm:$0xff] }
  0x21   : > { %571 = vmatpush.msra.mxu3 %v549_v56  ;;  %p844_p13 = pneg %p843_p12  ;;  %p848_p2 = por %p847_p1, %p846_p0 }
  0x22   : > { %512 = vmatpush.msra.mxu2 %v499_v27 }
  0x23   : > { %572 = vmatpush.msra.mxu3 %v548_v57  ;;  %p849_p3 = pnand %p848_p2, %p844_p13 }
  0x24   : > { %513 = vmatpush.msra.mxu2 %v498_v28 }
  0x25   : > { %573 = vmatpush.msra.mxu3 %v547_v58 }
  0x26   : > { %514 = vmatpush.msra.mxu2 %v497_v29  ;;  %v889_v29 = vmov 0  }
  0x27   : > { %799 = vset.pattern.permute.xlu0 %v889_v29 }
  0x28   : > { %515 = vmatpush.msra.mxu2 %v496_v30  ;;  %v804_v30 = vld [vmem:[#allocation2] ss:$0 sm:$0xff] }
  0x2a   : > { %516 = vmatpush.msra.mxu2 %v495_v31 }
  0x2c   : > { %517 = vmatpush.msra.mxu2 %v494_v32 }
  0x2e   : > { %518 = vmatpush.msra.mxu2 %v493_v33 }
  0x30   : > { %519 = vmatpush.msra.mxu2 %v492_v34 }
  0x32   : > { %520 = vmatpush.msra.mxu2 %v491_v35 }
  0x34   : > { %521 = vmatpush.msra.mxu2 %v490_v36 }
  0x36   : > { %522 = vmatpush.msra.mxu2 %v489_v37 }
  0x38   : > { %523 = vmatpush.msra.mxu2 %v488_v38 }
  0x98   : > { %v415_v8 = vpop.f32.mrf.mxu0 }
  0x99   : > { %v416_v9 = vadd.f32 %v800_v7, %v415_v8 }
  0x9b   : > { %v747_v10 = vmul.f32 -1.442695, %v416_v9 }
  0x9d   : > { %805 = vpow2.f32 %v747_v10 }
  0xa3   : > { %v806_v11 = vpop.eup %805 }
  0xa4   : > { %v421_v12 = vadd.f32 1.0, %v806_v11  ;;  %v598_v11 = vld [vmem:[%s1142_s9 + $0x8] sm:$0xff] }
  0xa5   : > { %621 = vmatpush.msrb.mxu0 %v598_v11 }
  0xa6   : > { %807 = vrcp.f32 %v421_v12  ;;  %v433_v16 = vand.u32 2147483648, %v421_v12  ;;  %v431_v18 = vand.u32 2147483647, %v421_v12  ;;  %vm427_vm3 = vweird.f32 %v421_v12 }
  0xa8   : > { %v434_v20 = vor.u32 1.1754944e-38, %v433_v16  ;;  %vm432_vm6 = vcmp.eq.f32.partialorder %v431_v18, 8.507059e+37 }
  0xac   : > { %v808_v13 = vpop.eup %807 }
  0xad   : > { %v423_v14 = vmul.f32 %v808_v13, %v421_v12  ;;  %vm428_vm2 = vweird.f32 %v808_v13  ;;  %v597_v12 = vld [vmem:[%s1142_s9] sm:$0xff] }
  0xae   : > { %vm429_vm4 = vmor %vm427_vm3, %vm428_vm2  ;;  %622 = vmatpush.msrb.mxu0 %v597_v12  ;;  %vm603_vm2 = vcmask 130048  }
  0xaf   : > { %v424_v15 = vsub.f32 1.0, %v423_v14 }
  0xb1   : > { %v425_v17 = vmul.f32 %v808_v13, %v424_v15 }
  0xb3   : > { %v426_v19 = vadd.f32 %v808_v13, %v425_v17 }
  0xb5   : > { %v430_v21 = vsel %vm429_vm4, %v808_v13, %v426_v19  ;;  %v803_v13 = vld [vmem:[%s1141_s8] ss:$0 sm:$0xff] }
  0xb6   : > { %v435_v22 = vsel %vm432_vm6, %v434_v20, %v430_v21 }
  0xb7   : > { %748 = vmatmul.msk.f32.vlgmr.msra.gmra.mxu1 %vm445_vm5, %v435_v22 }
 0x134   : > { %v466_v40 = vpop.f32.mrf.mxu1 }
 0x135   : > { %v467_v41 = vadd.f32 %v801_v39, %v466_v40 }
 0x137   : > { %v749_v42 = vmul.f32 -1.442695, %v467_v41 }
 0x139   : > { %809 = vpow2.f32 %v749_v42 }
 0x13f   : > { %v810_v43 = vpop.eup %809 }
 0x140   : > { %v472_v44 = vadd.f32 1.0, %v810_v43 }
 0x142   : > { %811 = vrcp.f32 %v472_v44  ;;  %v484_v48 = vand.u32 2147483648, %v472_v44  ;;  %v482_v50 = vand.u32 2147483647, %v472_v44  ;;  %vm478_vm8 = vweird.f32 %v472_v44 }
 0x144   : > { %v485_v52 = vor.u32 1.1754944e-38, %v484_v48  ;;  %vm483_vm10 = vcmp.eq.f32.partialorder %v482_v50, 8.507059e+37 }
 0x148   : > { %v812_v45 = vpop.eup %811 }
 0x149   : > { %v474_v46 = vmul.f32 %v812_v45, %v472_v44  ;;  %vm479_vm7 = vweird.f32 %v812_v45 }
 0x14a   : > { %vm480_vm9 = vmor %vm478_vm8, %vm479_vm7 }
 0x14b   : > { %v475_v47 = vsub.f32 1.0, %v474_v46 }
 0x14d   : > { %v476_v49 = vmul.f32 %v812_v45, %v475_v47  ;;  %v647_v47 = vlaneseq }
 0x14f   : > { %v477_v51 = vadd.f32 %v812_v45, %v476_v49  ;;  %v648_v49 = vand.u32 127, %v647_v47 }
 0x151   : > { %v481_v53 = vsel %vm480_vm9, %v812_v45, %v477_v51  ;;  %vm650_vm8 = vcmp.eq.s32.totalorder %v648_v49, 1  ;;  %vm649_vm9 = vcmp.eq.s32.totalorder %v648_v49, 0 }
 0x152   : > { %v486_v54 = vsel %vm483_vm10, %v485_v52, %v481_v53 }
 0x153   : > { %524 = vmatmul.f32.vlgmr.msra.gmra.mxu2 %v486_v54 }
 0x1d6   : > { %v525_v60 = vpop.f32.mrf.mxu2 }
 0x1d7   : > { %v526_v61 = vadd.f32 %v802_v59, %v525_v60 }
 0x1d9   : > { %v750_v62 = vmul.f32 -1.442695, %v526_v61 }
 0x1db   : > { %813 = vpow2.f32 %v750_v62 }
 0x1e1   : > { %v814_v63 = vpop.eup %813 }
 0x1e2   : > { %v531_v0 = vadd.f32 1.0, %v814_v63 }
 0x1e4   : > { %815 = vrcp.f32 %v531_v0  ;;  %v543_v4 = vand.u32 2147483648, %v531_v0  ;;  %v541_v6 = vand.u32 2147483647, %v531_v0  ;;  %vm537_vm12 = vweird.f32 %v531_v0 }
 0x1e6   : > { %v544_v8 = vor.u32 1.1754944e-38, %v543_v4  ;;  %vm542_vm14 = vcmp.eq.f32.partialorder %v541_v6, 8.507059e+37 }
 0x1ea   : > { %v816_v1 = vpop.eup %815 }
 0x1eb   : > { %v533_v2 = vmul.f32 %v816_v1, %v531_v0  ;;  %vm538_vm11 = vweird.f32 %v816_v1 }
 0x1ec   : > { %vm539_vm13 = vmor %vm537_vm12, %vm538_vm11 }
 0x1ed   : > { %v534_v3 = vsub.f32 1.0, %v533_v2 }
 0x1ef   : > { %v535_v5 = vmul.f32 %v816_v1, %v534_v3 }
 0x1f1   : > { %v536_v7 = vadd.f32 %v816_v1, %v535_v5 }
 0x1f3   : > { %v540_v9 = vsel %vm539_vm13, %v816_v1, %v536_v7 }
 0x1f4   : > { %v545_v10 = vsel %vm542_vm14, %v544_v8, %v540_v9 }
 0x1f5   : > { %751 = vmatmul.msk.f32.vlgmr.msra.gmra.mxu3 %vm445_vm5, %v545_v10 }
 0x278   : > { %v575_v14 = vpop.f32.mrf.mxu3 }
 0x279   : > { %v576_v15 = vadd.f32 %v803_v13, %v575_v14 }
 0x27b   : > { %v752_v16 = vmul.f32 -1.442695, %v576_v15 }
 0x27d   : > { %817 = vpow2.f32 %v752_v16 }
 0x283   : > { %v818_v17 = vpop.eup %817 }
 0x284   : > { %v581_v18 = vadd.f32 1.0, %v818_v17 }
 0x286   : > { %819 = vrcp.f32 %v581_v18  ;;  %v593_v22 = vand.u32 2147483648, %v581_v18  ;;  %v591_v24 = vand.u32 2147483647, %v581_v18  ;;  %vm587_vm0 = vweird.f32 %v581_v18 }
 0x288   : > { %v594_v26 = vor.u32 1.1754944e-38, %v593_v22  ;;  %vm592_vm3 = vcmp.eq.f32.partialorder %v591_v24, 8.507059e+37 }
 0x28c   : > { %v820_v19 = vpop.eup %819 }
 0x28d   : > { %v583_v20 = vmul.f32 %v820_v19, %v581_v18  ;;  %vm588_vm15 = vweird.f32 %v820_v19 }
 0x28e   : > { %vm589_vm1 = vmor %vm587_vm0, %vm588_vm15 }
 0x28f   : > { %v584_v21 = vsub.f32 1.0, %v583_v20 }
 0x291   : > { %v585_v23 = vmul.f32 %v820_v19, %v584_v21 }
 0x293   : > { %v586_v25 = vadd.f32 %v820_v19, %v585_v23 }
 0x295   : > { %v590_v27 = vsel %vm589_vm1, %v820_v19, %v586_v25 }
 0x296   : > { %v595_v28 = vsel %vm592_vm3, %v594_v26, %v590_v27 }
 0x297   : > { %753 = vmatmul.msk.f32.vlgmr.msrb.gmra.mxu0 %vm603_vm2, %v595_v28 }
 0x314   : > { %v624_v31 = vpop.f32.mrf.mxu0 }
 0x315   : > { %v625_v32 = vadd.f32 %v804_v30, %v624_v31 }
 0x317   : > { %v754_v33 = vmul.f32 -1.442695, %v625_v32 }
 0x319   : > { %821 = vpow2.f32 %v754_v33 }
 0x31f   : > { %v822_v34 = vpop.eup %821 }
 0x320   : > { %v630_v35 = vadd.f32 1.0, %v822_v34 }
 0x322   : > { %823 = vrcp.f32 %v630_v35  ;;  %v642_v39 = vand.u32 2147483648, %v630_v35  ;;  %v640_v41 = vand.u32 2147483647, %v630_v35  ;;  %vm636_vm5 = vweird.f32 %v630_v35 }
 0x324   : > { %v643_v43 = vor.u32 1.1754944e-38, %v642_v39  ;;  %vm641_vm7 = vcmp.eq.f32.partialorder %v640_v41, 8.507059e+37 }
 0x328   : > { %v824_v36 = vpop.eup %823 }
 0x329   : > { %v632_v37 = vmul.f32 %v824_v36, %v630_v35  ;;  %vm637_vm4 = vweird.f32 %v824_v36 }
 0x32a   : > { %vm638_vm6 = vmor %vm636_vm5, %vm637_vm4 }
 0x32b   : > { %v633_v38 = vsub.f32 1.0, %v632_v37 }
 0x32d   : > { %v634_v40 = vmul.f32 %v824_v36, %v633_v38 }
 0x32f   : > { %v635_v42 = vadd.f32 %v824_v36, %v634_v40 }
 0x331   : > { %v639_v44 = vsel %vm638_vm6, %v824_v36, %v635_v42 }
 0x332   : > { %v644_v45 = vsel %vm641_vm7, %v643_v43, %v639_v44 }
 0x333   : > { %653 = vperm.xlu0 %799, %v644_v45   ;;  %v646_v46 = vsub.f32 1.0, %v644_v45 }
 0x33b   : > { %659 = vperm.xlu0 %799, %v646_v46  }
 0x3a5   : > { %v654_v48 = vpop.permute.xlu0 %653 }
 0x3a6   : > { %v656_v50 = vsel %vm650_vm8, %v654_v48, 0.0 }
 0x3ad   : > { %v660_v51 = vpop.permute.xlu0 %659 }
 0x3ae   : > { %v662_v52 = vsel %vm649_vm9, %v660_v51, %v656_v50 }
 0x3af   : > { %663 = vst [vmem:[%s379_s12] sm:$0xff] %v662_v52 }
 0x3b0   : > { %852 = shalt.err (!%p849_p3)
}
 0x3b1   : > { %759 = dma.vmem_to_hbm [thread:$0]  (%p991_p5), %s678_s13, 128, %s680_s14, %s665_s15  }
 0x3b2 PF: > { %p765_p4 = scmp.ge.s32.totalorder %s887_s22, 2  ;;  %s691_s17 = sand.u32 1, %s875_s19  }
 0x3b3   : > { %s692_s30 = scalar_lea.sflag [#allocation4], %s691_s17 }
 0x3b4   : > { %p762_p7 = pnand %p765_p4, %p995_p6 }
 0x3b6   : > { %p763_p8 = pneg %p762_p7 }
 0x3b8   : > { %870 = dma.done.wait (%p763_p8), %s692_s30, 128  }
 0x3b9   : > { %872 = vsyncadd (%p763_p8), %s692_s30, 4294967168  ;;  %p23_p9 = scmp.ge.s32.totalorder %s978_s24, 4   ;;  %s1149_s19 = smov %s879_s20 }
 0x3ba   : > { %s1150_s20 = smov %s883_s21  ;;  %s1151_s21 = smov %s989_s27 }
 0x3bb   : > { %s1152_s22 = smov %s978_s24  ;;  %25 = sbr.rel (!%p23_p9) target bundleno = 6 (0x6), region = 99 }
 0x3c0   :  { %698 = vsyncpa [#allocation4], 1 }
 0x3c1   :  { %700 = vsyncpa [#allocation4 + $0x1], 1 }

</bundles_post_ra>
